<compile_context>
chip_gen: v7x
topology: tpu7x:2x2x1
jax: 0.10.0
libtpu: 0.0.40
codegen_flags: <defaults>
</compile_context>

<pallas_src>
import functools

import numpy as np
import jax
import jax.numpy as jnp
from jax.experimental import pallas as pl
from jax.experimental.pallas import tpu as pltpu


def _round_up(v, m):
    return -(-v // m) * m


def _sublane_multiple(dtype):
    # 32-bit -> 8 sublanes, 16-bit -> 16, 8-bit -> 32 (packed-sublane rule).
    return max(8, 32 // jnp.dtype(dtype).itemsize)


def _masked_mean_kernel(x_ref, m_ref, o_ref):
    # x_ref: (TB, P, D)   m_ref: (TB, P) narrow dtype   o_ref: (TB, D)
    m = m_ref[...].astype(jnp.float32)                       # in-kernel cast (rides idle VPU)
    xs = x_ref[...].astype(jnp.float32)
    s = jnp.sum(xs * m[:, :, None], axis=1)                  # (TB, D) f32 VPU/XLU reduce
    denom = jnp.maximum(jnp.sum(m, axis=1, keepdims=True), 1e-30)  # all-masked rows -> 0, not NaN
    o_ref[...] = (s / denom).astype(o_ref.dtype)


def _mean_kernel(x_ref, o_ref, *, inv_p):
    # mask=None path: plain mean over P; no ones-mask is materialized or DMA'd.
    s = jnp.sum(x_ref[...].astype(jnp.float32), axis=1)
    o_ref[...] = (s * inv_p).astype(o_ref.dtype)


def _tile_target_bytes():
    """Per-buffer x-tile target using padded-dim VMEM accounting."""
    kind = ""
    try:
        kind = jax.devices()[0].device_kind.lower()
    except Exception:
        pass
    if "v7" in kind:
        # 3.2 TB/s HBM: a 2 MiB step is ~0.6 us of DMA vs 0.35 us step
        # overhead; 8 MiB tiles (16 MiB double-buffered) sit well inside the
        # 32 MiB scoped default / 64 MiB physical VMEM.
        return 8 << 20
    # Safe everywhere (v5e scoped default is 16 MiB: 2 x 4 MiB x-buffers plus
    # small mask/out buffers fit), and already ~86% of the pipelining curve.
    return 4 << 20


def _pick_tb(B, P, D, x_dtype, mult):
    """Batch rows per grid step, sized from the PADDED VMEM footprint."""
    x_item = jnp.dtype(x_dtype).itemsize
    x_mult = _sublane_multiple(x_dtype)
    d_pad = _round_up(D, 128)          # lane padding
    p_pad = _round_up(P, x_mult)       # sublane padding of the x tile
    row_bytes = max(1, p_pad * d_pad * x_item)

    tb = max(1, _tile_target_bytes() // row_bytes)
    if tb >= B:
        # v7x has 2 TensorCores: keep >=2 grid steps when the input is big
        # enough that cross-TC sharding / DMA-compute overlap matters.
        if B >= 2 * mult and B * row_bytes > (1 << 20):
            half = _round_up(-(-B // 2), mult)
            if half < B:
                return half
        return B
    tb = max(mult, (tb // mult) * mult)
    return min(tb, B)


def pooling_forward(x, mask=None, tb=None):
    """Equivalent of Pooling.forward (masked mean pooling as the concrete op).

    x:    [batch, ..., P, D]
    mask: [batch, ..., P] or None (treated as all-ones)
    returns: [batch, ..., D]
    """
    shape = list(x.shape)
    P, D = shape[-2], shape[-1]
    B = int(np.prod(shape[:-2])) if len(shape) > 2 else 1
    y = jnp.reshape(x, (B, P, D))

    if mask is not None:
        # Keep mask narrow on the wire; cast to f32 inside the kernel.
        m = mask.astype(jnp.bfloat16) if mask.dtype == jnp.bool_ else mask
        m = jnp.reshape(m, (B, P))
        mult = max(_sublane_multiple(x.dtype), _sublane_multiple(m.dtype))
    else:
        m = None
        mult = _sublane_multiple(x.dtype)

    if tb is None:
        tb = _pick_tb(B, P, D, x.dtype, mult)
    else:
        tb = int(tb)
        tb = B if tb >= B else min(B, _round_up(tb, mult))

    grid = (pl.cdiv(B, tb),)
    params = pltpu.CompilerParams(dimension_semantics=("parallel",))

    if m is None:
        out = pl.pallas_call(
            functools.partial(_mean_kernel, inv_p=float(1.0 / P)),
            out_shape=jax.ShapeDtypeStruct((B, D), x.dtype),
            grid=grid,
            in_specs=[pl.BlockSpec((tb, P, D), lambda b: (b, 0, 0))],
            out_specs=pl.BlockSpec((tb, D), lambda b: (b, 0)),
            compiler_params=params,
        )(y)
    else:
        out = pl.pallas_call(
            _masked_mean_kernel,
            out_shape=jax.ShapeDtypeStruct((B, D), x.dtype),
            grid=grid,
            in_specs=[
                pl.BlockSpec((tb, P, D), lambda b: (b, 0, 0)),
                pl.BlockSpec((tb, P), lambda b: (b, 0)),
            ],
            out_specs=pl.BlockSpec((tb, D), lambda b: (b, 0)),
            compiler_params=params,
        )(y, m)

    # Same output-reshape semantics as the PyTorch module.
    shape[-2] = -1
    return jnp.reshape(out, shape[:-1])


def _reference(x, mask=None):
    # pure-JAX reference of masked mean pooling with the same reshape semantics
    shape = list(x.shape)
    P, D = shape[-2], shape[-1]
    B = int(np.prod(shape[:-2])) if len(shape) > 2 else 1
    y = jnp.reshape(x, (B, P, D)).astype(jnp.float32)
    if mask is None:
        m = jnp.ones((B, P), dtype=jnp.float32)
    else:
        m = jnp.reshape(mask.astype(jnp.float32), (B, P))
    z = jnp.sum(y * m[:, :, None], axis=1) / jnp.sum(m, axis=1, keepdims=True)
    shape[-2] = -1
    return jnp.reshape(z.astype(x.dtype), shape[:-1])


if __name__ == "__main__":
    key = jax.random.PRNGKey(0)
    kx, km, kx2, km2 = jax.random.split(key, 4)

    # x: [batch=2, groups=4, pooling_dim=8, d_model=32]
    x = jax.random.normal(kx, (2, 4, 8, 32), dtype=jnp.float32)
    mask = (jax.random.uniform(km, (2, 4, 8)) > 0.3).astype(jnp.float32)
    # ensure every row has at least one valid position (avoid 0/0 in the reference)
    mask = mask.at[..., 0].set(1.0)

    # with explicit mask
    out = jax.block_until_ready(pooling_forward(x, mask))
    ref = _reference(x, mask)
    assert out.shape == (2, 4, 32), out.shape
    np.testing.assert_allclose(np.asarray(out), np.asarray(ref), rtol=1e-5, atol=1e-5)

    # mask=None path (plain mean over the pooling dim)
    out2 = jax.block_until_ready(pooling_forward(x, None))
    ref2 = _reference(x, None)
    np.testing.assert_allclose(np.asarray(out2), np.asarray(ref2), rtol=1e-5, atol=1e-5)

    # Ragged last block (B % TB != 0) with no host-side padding, bool mask
    # (bf16 on the wire) path; TB forced small to exercise multi-block grid.
    x3 = jax.random.normal(kx2, (20, 8, 32), dtype=jnp.float32)
    mask3 = jax.random.uniform(km2, (20, 8)) > 0.3
    mask3 = mask3.at[:, 0].set(True)
    out3 = jax.block_until_ready(pooling_forward(x3, mask3, tb=16))
    ref3 = _reference(x3, mask3)
    assert out3.shape == (20, 32), out3.shape
    np.testing.assert_allclose(np.asarray(out3), np.asarray(ref3), rtol=1e-5, atol=1e-5)

    print("KERNEL_OK")
</pallas_src>

<mosaic_0001>
module attributes {stable_mosaic.version = 11 : i64} {
  func.func @_masked_mean_kernel(%arg0: i32, %arg1: memref<8x8x32xf32, #tpu.memory_space<vmem>>, %arg2: memref<8x8xf32, #tpu.memory_space<vmem>>, %arg3: memref<8x32xf32, #tpu.memory_space<vmem>>) attributes {dimension_semantics = [#tpu.dimension_semantics<parallel>], iteration_bounds = array<i64: 1>, scalar_prefetch = 0 : i64, scratch_operands = 0 : i64, tpu.core_type = #tpu.core_type<tc>, window_params = [{transform_indices = @transform_0, window_bounds = array<i64: 8, 8, 32>}, {transform_indices = @transform_1, window_bounds = array<i64: 8, 8>}, {transform_indices = @transform_2, window_bounds = array<i64: 8, 32>}]} {
    %c0 = arith.constant 0 : index
    %c0_0 = arith.constant 0 : index
    %0 = vector.load %arg2[%c0, %c0_0] : memref<8x8xf32, #tpu.memory_space<vmem>>, vector<8x8xf32>
    %c0_1 = arith.constant 0 : index
    %c0_2 = arith.constant 0 : index
    %c0_3 = arith.constant 0 : index
    %1 = vector.load %arg1[%c0_1, %c0_2, %c0_3] : memref<8x8x32xf32, #tpu.memory_space<vmem>>, vector<8x8x32xf32>
    %2 = vector.shape_cast %0 : vector<8x8xf32> to vector<8x8x1xf32>
    %3 = vector.broadcast %2 : vector<8x8x1xf32> to vector<8x8x32xf32>
    %4 = arith.mulf %1, %3 : vector<8x8x32xf32>
    %cst = arith.constant dense<0.000000e+00> : vector<8x32xf32>
    %5 = vector.multi_reduction <add>, %4, %cst [1] : vector<8x8x32xf32> to vector<8x32xf32>
    %cst_4 = arith.constant dense<0.000000e+00> : vector<8xf32>
    %6 = vector.multi_reduction <add>, %0, %cst_4 [1] : vector<8x8xf32> to vector<8xf32>
    %7 = vector.shape_cast %6 : vector<8xf32> to vector<8x1xf32>
    %cst_5 = arith.constant 1.000000e-30 : f32
    %8 = vector.broadcast %cst_5 : f32 to vector<8x1xf32>
    %9 = arith.maximumf %7, %8 : vector<8x1xf32>
    %10 = vector.broadcast %9 : vector<8x1xf32> to vector<8x32xf32>
    %11 = arith.divf %5, %10 : vector<8x32xf32>
    %c0_6 = arith.constant 0 : index
    %c0_7 = arith.constant 0 : index
    %12 = vector.load %arg3[%c0_6, %c0_7] : memref<8x32xf32, #tpu.memory_space<vmem>>, vector<8x32xf32>
    tpu.vector_store %arg3[%c0_6, %c0_7], %11 {strides = array<i32>} : memref<8x32xf32, #tpu.memory_space<vmem>>, vector<8x32xf32>,
    return
  }
  func.func @transform_0(%arg0: i32) -> (i32, i32, i32) {
    %c0_i32 = arith.constant 0 : i32
    %c0_i32_0 = arith.constant 0 : i32
    %c0_i32_1 = arith.constant 0 : i32
    return %arg0, %c0_i32, %c0_i32_0 : i32, i32, i32
  }
  func.func @transform_1(%arg0: i32) -> (i32, i32) {
    %c0_i32 = arith.constant 0 : i32
    %c0_i32_0 = arith.constant 0 : i32
    return %arg0, %c0_i32 : i32, i32
  }
  func.func @transform_2(%arg0: i32) -> (i32, i32) {
    %c0_i32 = arith.constant 0 : i32
    %c0_i32_0 = arith.constant 0 : i32
    return %arg0, %c0_i32 : i32, i32
  }
}

</mosaic_0001>

<bundles_post_ra>
// kernel: tpu_custom_call.1
= control target key start
LH: loop header
LB: loop body
LE: loop exit
PB: predicated region body
PF: predicated region fallthrough
CT: control target
= control target key end

     0   :  { %7 = vsyncpa [#allocation3], 0  ;;  %s410_s0 = inlined_call_operand.hbm [shape: f32[8,8,32], index: 0, kind: input, shape index: {}]   ;;  %s411_s1 = inlined_call_operand.hbm [shape: f32[8,8], index: 1, kind: input, shape index: {}]   ;;  %s412_s2 = inlined_call_operand.hbm [shape: f32[8,32], index: 2, kind: output, shape index: {}]  }
   0x1   :  { %8 = vsyncpa [#allocation6], 0 }
   0x2   :  { %9 = vsyncpa [#allocation4], 0  ;;  %s345_s9 = smov [#allocation2]   ;;  %s273_s13 = scalar_lea.hbm %s410_s0, 1024 }
   0x3   :  { %s15_s10 = sshll.u32 %s345_s9, 4  ;;  %p274_p0 = scmp.ne.s32.totalorder %s410_s0, %s273_s13  ;;  %s16_s10 = int_to_ptr.vmem [resolvable:$true] %s15_s10 }
   0x4   :  { %p277_p1 = scmp.lt.u32.totalorder %s273_s13, %s410_s0 }
   0x6   :  { %p279_p2 = pnand %p277_p1, %p274_p0 }
   0x8   :  { %282 = shalt.err (!%p279_p2)
}
   0x9   :  { %s283_s18 = scalar_lea.vmem %s16_s10, 1024  ;;  %p288_p4 = scmp.lt.s32.totalorder %s16_s10, %s16_s10 }
   0xa   :  { %p284_p3 = scmp.ne.s32.totalorder %s16_s10, %s283_s18  ;;  %p289_p5 = scmp.lt.s32.totalorder %s283_s18, %s283_s18 }
   0xc   :  { %p290_p6 = por %p289_p5, %p288_p4 }
   0xe   :  { %p291_p7 = pnand %p290_p6, %p284_p3 }
  0x10   :  { %294 = shalt.err (!%p291_p7)
}
  0x11   :  { %s346_s19 = smov 128   ;;  %s347_s20 = smov 8  }
  0x12   :  { %21 = dma.hbm_to_vmem [thread:$0]  %s410_s0, 1024, %s16_s10, [#allocation3], %s346_s19, %s346_s19, %s347_s20  }
  0x13   :  { %s348_s23 = smov [#allocation5]   ;;  %s295_s27 = scalar_lea.hbm %s411_s1, 128 }
  0x14   :  { %s28_s24 = sshll.u32 %s348_s23, 4  ;;  %p296_p8 = scmp.ne.s32.totalorder %s411_s1, %s295_s27  ;;  %s29_s24 = int_to_ptr.vmem [resolvable:$true] %s28_s24 }
  0x15   :  { %p299_p9 = scmp.lt.u32.totalorder %s295_s27, %s411_s1 }
  0x17   :  { %p301_p10 = pnand %p299_p9, %p296_p8 }
  0x19   :  { %304 = shalt.err (!%p301_p10)
}
  0x1a   :  { %s305_s4 = scalar_lea.vmem %s29_s24, 128  ;;  %p310_p12 = scmp.lt.s32.totalorder %s29_s24, %s29_s24 }
  0x1b   :  { %p306_p11 = scmp.ne.s32.totalorder %s29_s24, %s305_s4  ;;  %p311_p13 = scmp.lt.s32.totalorder %s305_s4, %s305_s4 }
  0x1d   :  { %p312_p0 = por %p311_p13, %p310_p12 }
  0x1f   :  { %p313_p1 = pnand %p312_p0, %p306_p11 }
  0x21   :  { %316 = shalt.err (!%p313_p1)
}
  0x22   :  { %31 = dma.hbm_to_vmem [thread:$0]  %s411_s1, 128, %s29_s24, [#allocation6]  }
  0x23   :  { %339 = dma.done.wait [#allocation3], 1024  }
  0x24   :  { %340 = vsyncadd [#allocation3], 4294966272 }
  0x25   :  { %341 = dma.done.wait [#allocation6], 128  }
  0x26   :  { %342 = vsyncadd [#allocation6], 4294967168  ;;  %v47_v0 = vlaneseq  ;;  %vm168_vm0 = vcmask 64512   ;;  %v38_v4 = vld [vmem:[#allocation5] sm:$0xff]  ;;  %v41_v23 = vld [vmem:[#allocation2 + $0x10] sm:$0xff]  ;;  %vm111_vm1 = vcmask 261120  }
  0x27   :  { %v169_v5 = vsel %vm168_vm0, %v38_v4, 0.0  ;;  %v39_v26 = vld [vmem:[#allocation2] sm:$0xff]  ;;  %v42_v27 = vld [vmem:[#allocation2 + $0x18] sm:$0xff]  ;;  %v44_v30 = vld [vmem:[#allocation2 + $0x28] sm:$0xff]  ;;  %vm214_vm2 = vcmask 1041409   ;;  %vm217_vm3 = vcmask 1042434  }
  0x28   :  { %v48_v1 = vshrl.u32 %v47_v0, 7  ;;  %170 = vadd.xlane.f32.xlu0 %v169_v5  ;;  %v43_v28 = vld [vmem:[#allocation2 + $0x20] sm:$0xff]  ;;  %v45_v35 = vld [vmem:[#allocation2 + $0x30] sm:$0xff]  ;;  %v46_v43 = vld [vmem:[#allocation2 + $0x38] sm:$0xff]  ;;  %vm220_vm4 = vcmask 1043459   ;;  %vm223_vm5 = vcmask 1044484  }
  0x29   :  { %v40_v62 = vld [vmem:[#allocation2 + $0x8] sm:$0xff]  ;;  %vm226_vm6 = vcmask 1045509   ;;  %vm229_vm7 = vcmask 1046534   ;;  %s349_s1 = smov [#allocation7]   ;;  %vm232_vm8 = vcmask 1047559  }
  0x2a   :  { %v63_v2 = vsub.s32 2, %v48_v1  ;;  %v49_v3 = vsub.s32 0, %v48_v1  ;;  %v70_v8 = vsub.s32 3, %v48_v1  ;;  %v77_v10 = vsub.s32 4, %v48_v1  ;;  %s242_s6 = sshll.u32 %s349_s1, 4  ;;  %s243_s6 = int_to_ptr.vmem [resolvable:$true] %s242_s6 }
  0x2b   :  { %v84_v12 = vsub.s32 5, %v48_v1  ;;  %v91_v14 = vsub.s32 6, %v48_v1  ;;  %v56_v15 = vsub.s32 1, %v48_v1  ;;  %v98_v17 = vsub.s32 7, %v48_v1  ;;  %s317_s7 = scalar_lea.vmem %s243_s6, 128  ;;  %p322_p3 = scmp.lt.s32.totalorder %s243_s6, %s243_s6 }
  0x2c   :  { %v64_v6 = vrot.slane %v38_v4, %v63_v2  ;;  %v50_v7 = vrot.slane %v38_v4, %v49_v3  ;;  %v71_v9 = vrot.slane %v38_v4, %v70_v8  ;;  %v78_v11 = vrot.slane %v38_v4, %v77_v10  ;;  %p318_p2 = scmp.ne.s32.totalorder %s243_s6, %s317_s7  ;;  %p323_p4 = scmp.lt.s32.totalorder %s317_s7, %s317_s7 }
  0x2d   :  { %v85_v13 = vrot.slane %v38_v4, %v84_v12  ;;  %v92_v16 = vrot.slane %v38_v4, %v91_v14  ;;  %v57_v18 = vrot.slane %v38_v4, %v56_v15  ;;  %v99_v19 = vrot.slane %v38_v4, %v98_v17 }
  0x2e   :  { %66 = vbcast.lane.b32.xlu1 %v64_v6, 256  ;;  %p324_p5 = por %p323_p4, %p322_p3 }
  0x30   :  { %p325_p6 = pnand %p324_p5, %p318_p2 }
  0x32   :  { %52 = vbcast.lane.b32.xlu1 %v50_v7, 256 }
  0x36   :  { %73 = vbcast.lane.b32.xlu1 %v71_v9, 256 }
  0x3a   :  { %80 = vbcast.lane.b32.xlu1 %v78_v11, 256 }
  0x3e   :  { %87 = vbcast.lane.b32.xlu1 %v85_v13, 256  ;;  %59 = vbcast.lane.b32.xlu0 %v57_v18, 256 }
  0x42   :  { %94 = vbcast.lane.b32.xlu1 %v92_v16, 256 }
  0x46   :  { %101 = vbcast.lane.b32.xlu1 %v99_v19, 256 }
  0xa0   :  { %v67_v20 = vpop.permute.xlu1 %66 }
  0xa1   :  { %v105_v25 = vmul.f32 %v67_v20, %v41_v23 }
  0xa3   :  { %v126_v32 = vsel %vm111_vm1, %v105_v25, 0.0 }
  0xa4   :  { %v53_v21 = vpop.permute.xlu1 %52  ;;  %v127_v37 = vrot.slane %v126_v32, 4 }
  0xa5   :  { %v103_v29 = vmul.f32 %v53_v21, %v39_v26 }
  0xa6   :  { %v128_v47 = vadd.f32 %v127_v37, %v126_v32 }
  0xa7   :  { %v112_v38 = vsel %vm111_vm1, %v103_v29, 0.0 }
  0xa8   :  { %v74_v22 = vpop.permute.xlu1 %73  ;;  %v113_v44 = vrot.slane %v112_v38, 4  ;;  %v129_v58 = vrot.slane %v128_v47, 2 }
  0xa9   :  { %v106_v33 = vmul.f32 %v74_v22, %v42_v27 }
  0xaa   :  { %v114_v55 = vadd.f32 %v113_v44, %v112_v38  ;;  %v130_v19 = vadd.f32 %v129_v58, %v128_v47 }
  0xab   :  { %v133_v40 = vsel %vm111_vm1, %v106_v33, 0.0 }
  0xac   :  { %v81_v24 = vpop.permute.xlu1 %80  ;;  %v134_v48 = vrot.slane %v133_v40, 4  ;;  %v115_v7 = vrot.slane %v114_v55, 2 }
  0xad   :  { %v107_v34 = vmul.f32 %v81_v24, %v43_v28  ;;  %v131_v28 = vrot.slane %v130_v19, 1 }
  0xae   :  { %v135_v59 = vadd.f32 %v134_v48, %v133_v40  ;;  %v116_v22 = vadd.f32 %v115_v7, %v114_v55 }
  0xaf   :  { %v140_v41 = vsel %vm111_vm1, %v107_v34, 0.0 }
  0xb0   :  { %v88_v31 = vpop.permute.xlu1 %87  ;;  %v141_v49 = vrot.slane %v140_v41, 4  ;;  %v136_v10 = vrot.slane %v135_v59, 2  ;;  %v117_v33 = vrot.slane %v116_v22, 1 }
  0xb1   :  { %v108_v36 = vmul.f32 %v88_v31, %v44_v30 }
  0xb2   :  { %v142_v60 = vadd.f32 %v141_v49, %v140_v41  ;;  %v137_v20 = vadd.f32 %v136_v10, %v135_v59  ;;  %v132_v41 = vadd.f32 %v131_v28, %v130_v19 }
  0xb3   :  { %v147_v45 = vsel %vm111_vm1, %v108_v36, 0.0 }
  0xb4   :  { %v95_v39 = vpop.permute.xlu1 %94  ;;  %v148_v53 = vrot.slane %v147_v45, 4  ;;  %v143_v11 = vrot.slane %v142_v60, 2  ;;  %v138_v30 = vrot.slane %v137_v20, 1 }
  0xb5   :  { %v109_v42 = vmul.f32 %v95_v39, %v45_v35  ;;  %v171_v54 = vpop.xlane.xlu0 %170 }
  0xb6   :  { %v172_v56 = vmax.f32 %v171_v54, 1e-30  ;;  %v149_v3 = vadd.f32 %v148_v53, %v147_v45  ;;  %v144_v23 = vadd.f32 %v143_v11, %v142_v60 }
  0xb7   :  { %v154_v46 = vsel %vm111_vm1, %v109_v42, 0.0 }
  0xb8   :  { %v102_v50 = vpop.permute.xlu1 %101  ;;  %v155_v51 = vrot.slane %v154_v46, 4  ;;  %v174_v0 = vrot.slane %v172_v56, 1  ;;  %v175_v1 = vrot.slane %v172_v56, 2  ;;  %v176_v2 = vrot.slane %v172_v56, 3 }
  0xb9   :  { %v110_v52 = vmul.f32 %v102_v50, %v46_v43  ;;  %257 = vrcp.f32 %v172_v56  ;;  %v60_v5 = vpop.permute.xlu0 %59  ;;  %v177_v6 = vrot.slane %v172_v56, 4  ;;  %v178_v9 = vrot.slane %v172_v56, 5 }
  0xba   :  { %v156_v63 = vadd.f32 %v155_v51, %v154_v46  ;;  %259 = vrcp.f32 %v174_v0  ;;  %v104_v8 = vmul.f32 %v60_v5, %v40_v62  ;;  %v179_v12 = vrot.slane %v172_v56, 6 }
  0xbb   :  { %v161_v57 = vsel %vm111_vm1, %v110_v52, 0.0  ;;  %261 = vrcp.f32 %v175_v1  ;;  %v180_v15 = vrot.slane %v172_v56, 7  ;;  %v150_v16 = vrot.slane %v149_v3, 2 }
  0xbc   :  { %v162_v61 = vrot.slane %v161_v57, 4  ;;  %v157_v13 = vrot.slane %v156_v63, 2  ;;  %v119_v14 = vsel %vm111_vm1, %v104_v8, 0.0  ;;  %263 = vrcp.f32 %v176_v2 }
  0xbd   :  { %v120_v18 = vrot.slane %v119_v14, 4  ;;  %265 = vrcp.f32 %v177_v6  ;;  %v151_v25 = vadd.f32 %v150_v16, %v149_v3  ;;  %v145_v34 = vrot.slane %v144_v23, 1 }
  0xbe   :  { %v163_v4 = vadd.f32 %v162_v61, %v161_v57  ;;  %267 = vrcp.f32 %v178_v9  ;;  %v158_v24 = vadd.f32 %v157_v13, %v156_v63  ;;  %v139_v43 = vadd.f32 %v138_v30, %v137_v20 }
  0xbf   :  { %v121_v21 = vadd.f32 %v120_v18, %v119_v14  ;;  %269 = vrcp.f32 %v179_v12  ;;  %v152_v37 = vrot.slane %v151_v25, 1  ;;  %v118_v46 = vadd.f32 %v117_v33, %v116_v22 }
  0xc0   :  { %v164_v17 = vrot.slane %v163_v4, 2  ;;  %271 = vrcp.f32 %v180_v15  ;;  %v159_v35 = vrot.slane %v158_v24, 1  ;;  %v146_v47 = vadd.f32 %v145_v34, %v144_v23 }
  0xc1   :  { %v122_v27 = vrot.slane %v121_v21, 2  ;;  %v153_v51 = vadd.f32 %v152_v37, %v151_v25 }
  0xc2   :  { %v165_v26 = vadd.f32 %v164_v17, %v163_v4  ;;  %v160_v48 = vadd.f32 %v159_v35, %v158_v24 }
  0xc3   :  { %v258_v29 = vpop.eup %257  ;;  %v123_v31 = vadd.f32 %v122_v27, %v121_v21 }
  0xc4   :  { %v260_v32 = vpop.eup %259  ;;  %v166_v38 = vrot.slane %v165_v26, 1  ;;  %v190_v57 = vmul.f32 %v258_v29, %v118_v46 }
  0xc5   :  { %v262_v36 = vpop.eup %261  ;;  %v124_v39 = vrot.slane %v123_v31, 1 }
  0xc6   :  { %v264_v40 = vpop.eup %263  ;;  %v194_v49 = vmul.f32 %v262_v36, %v132_v41  ;;  %v167_v52 = vadd.f32 %v166_v38, %v165_v26 }
  0xc7   :  { %v266_v42 = vpop.eup %265  ;;  %v125_v44 = vadd.f32 %v124_v39, %v123_v31  ;;  %v196_v54 = vmul.f32 %v264_v40, %v139_v43 }
  0xc8   :  { %v268_v45 = vpop.eup %267  ;;  %v198_v56 = vmul.f32 %v266_v42, %v146_v47  ;;  %v216_v61 = vrot.slane %v194_v49, 6 }
  0xc9   :  { %v270_v50 = vpop.eup %269  ;;  %v192_v53 = vmul.f32 %v260_v32, %v125_v44  ;;  %v200_v59 = vmul.f32 %v268_v45, %v153_v51  ;;  %v219_v0 = vrot.slane %v196_v54, 5 }
  0xca   :  { %v272_v55 = vpop.eup %271  ;;  %v202_v60 = vmul.f32 %v270_v50, %v160_v48  ;;  %v222_v2 = vrot.slane %v198_v56, 4 }
  0xcb   :  { %v213_v58 = vrot.slane %v192_v53, 7  ;;  %v204_v63 = vmul.f32 %v272_v55, %v167_v52  ;;  %v225_v4 = vrot.slane %v200_v59, 3 }
  0xcc   :  { %v228_v6 = vrot.slane %v202_v60, 2 }
  0xcd   :  { %v215_v62 = vsel %vm214_vm2, %v213_v58, %v190_v57  ;;  %v231_v8 = vrot.slane %v204_v63, 1 }
  0xce   :  { %v218_v1 = vsel %vm217_vm3, %v216_v61, %v215_v62 }
  0xcf   :  { %v221_v3 = vsel %vm220_vm4, %v219_v0, %v218_v1 }
  0xd0   :  { %v224_v5 = vsel %vm223_vm5, %v222_v2, %v221_v3 }
  0xd1   :  { %v227_v7 = vsel %vm226_vm6, %v225_v4, %v224_v5 }
  0xd2   :  { %v230_v9 = vsel %vm229_vm7, %v228_v6, %v227_v7 }
  0xd3   :  { %v233_v10 = vsel %vm232_vm8, %v231_v8, %v230_v9 }
  0xd4   :  { %235 = vst.msk [vmem:[#allocation7] sm:$0xff] %vm111_vm1, %v233_v10 }
  0xd5   :  { %328 = shalt.err (!%p325_p6)
}
  0xd6   :  { %s329_s10 = scalar_lea.hbm %s412_s2, 128 }
  0xd7   :  { %p330_p7 = scmp.ne.s32.totalorder %s412_s2, %s329_s10  ;;  %p333_p8 = scmp.lt.u32.totalorder %s329_s10, %s412_s2 }
  0xd9   :  { %p335_p9 = pnand %p333_p8, %p330_p7 }
  0xdb   :  { %338 = shalt.err (!%p335_p9)
}
  0xdc   :  { %245 = dma.vmem_to_hbm [thread:$0]  %s243_s6, 128, %s412_s2, [#allocation4]  }
  0xdd   :  { %343 = dma.done.wait [#allocation4], 128  }
  0xde   :  { %344 = vsyncadd [#allocation4], 4294967168 }
  0xdf   :  { %249 = vsyncpa [#allocation3], 1 }
  0xe0   :  { %250 = vsyncpa [#allocation6], 1 }
  0xe1   :  { %251 = vsyncpa [#allocation4], 1 }

</bundles_post_ra>
